<compile_context>
chip_gen: v5e
topology: v5e:2x2
jax: 0.10.0
libtpu: 0.0.40
codegen_flags: <defaults>
</compile_context>

<pallas_src>
import functools

import jax
import jax.numpy as jnp
import numpy as np
from jax.experimental import pallas as pl
from jax.experimental.pallas import tpu as pltpu


# --------------------- pool / sum : row-restricted matmul -------------------
def _restricted_kernel(x_ref, tri_ref, inv_ref, out_ref, acc_ref, *, pool):
    """out[r, :] = sum_{j <= global_row(r)} x[j, :]   (optionally * 1/count)."""
    k = pl.program_id(2)

    @pl.when(k == 0)
    def _():
        acc_ref[...] = jnp.zeros_like(acc_ref)

    # (l_output, lk) @ (lk, td) on the MXU, f32 accumulation.
    acc_ref[...] += jnp.dot(tri_ref[...], x_ref[...],
                            preferred_element_type=jnp.float32)

    @pl.when(k == pl.num_programs(2) - 1)
    def _():
        r = acc_ref[...]
        if pool:
            r = r * inv_ref[...]          # exact f32 1/count, applied once
        out_ref[...] = r.astype(out_ref.dtype)


def _pool_sum_restricted(x, *, mode, l_output, lk, td):
    B, L, D = x.shape
    nd, nk = D // td, L // lk
    # Triangular selector restricted to the kept rows: shape (l_output, L).
    rows = jnp.arange(l_output, dtype=jnp.int32)[:, None] + (L - l_output)
    cols = jnp.arange(L, dtype=jnp.int32)[None, :]
    tri = (cols <= rows).astype(x.dtype)            # 0/1 -> exact even in bf16
    inv = 1.0 / (rows.astype(jnp.float32) + 1.0)    # (l_output, 1) f32

    return pl.pallas_call(
        functools.partial(_restricted_kernel, pool=(mode == "pool")),
        out_shape=jax.ShapeDtypeStruct((B, l_output, D), x.dtype),
        grid_spec=pltpu.PrefetchScalarGridSpec(
            num_scalar_prefetch=0,
            grid=(B, nd, nk),
            in_specs=[
                pl.BlockSpec((None, lk, td), lambda b, d, k: (b, k, d)),
                pl.BlockSpec((l_output, lk), lambda b, d, k: (0, k)),
                pl.BlockSpec((l_output, 1), lambda b, d, k: (0, 0)),
            ],
            out_specs=pl.BlockSpec((None, l_output, td),
                                   lambda b, d, k: (b, 0, d)),
            scratch_shapes=[pltpu.VMEM((l_output, td), jnp.float32)],
        ),
        compiler_params=pltpu.CompilerParams(
            dimension_semantics=("parallel", "parallel", "arbitrary")),
    )(x, tri, inv)


# --------------------- pool / sum : chunked prefix scan ---------------------
def _scan_kernel(x_ref, tri_ref, inv_ref, out_ref, carry_ref, *, pool):
    lc = pl.program_id(2)

    @pl.when(lc == 0)
    def _():
        carry_ref[...] = jnp.zeros_like(carry_ref)

    # Per-chunk cumsum via (Lc, Lc) triangular matmul + running prefix carry.
    cs = jnp.dot(tri_ref[...], x_ref[...],
                 preferred_element_type=jnp.float32) + carry_ref[...]
    carry_ref[...] = cs[-1:, :]          # running total of all rows so far
    if pool:
        cs = cs * inv_ref[...]
    out_ref[...] = cs.astype(out_ref.dtype)


def _pool_sum_scan(x, *, mode, lc, td):
    B, L, D = x.shape
    nd, nl = D // td, L // lc
    tri = jnp.tril(jnp.ones((lc, lc), x.dtype))                      # (Lc, Lc)
    inv = (1.0 / jnp.arange(1, L + 1, dtype=jnp.float32))[:, None]   # (L, 1)

    return pl.pallas_call(
        functools.partial(_scan_kernel, pool=(mode == "pool")),
        out_shape=jax.ShapeDtypeStruct((B, L, D), x.dtype),
        grid_spec=pltpu.PrefetchScalarGridSpec(
            num_scalar_prefetch=0,
            grid=(B, nd, nl),
            in_specs=[
                pl.BlockSpec((None, lc, td), lambda b, d, l: (b, l, d)),
                pl.BlockSpec((lc, lc), lambda b, d, l: (0, 0)),
                pl.BlockSpec((lc, 1), lambda b, d, l: (l, 0)),
            ],
            out_specs=pl.BlockSpec((None, lc, td), lambda b, d, l: (b, l, d)),
            scratch_shapes=[pltpu.VMEM((1, td), jnp.float32)],
        ),
        compiler_params=pltpu.CompilerParams(
            dimension_semantics=("parallel", "parallel", "arbitrary")),
    )(x, tri, inv)


# --------------------------- first / last : slice ---------------------------
def _slice_kernel(x_hbm, out_ref, buf_ref, *, row_start):
    b = pl.program_id(0)
    d = pl.program_id(1)
    lo, td = out_ref.shape
    col = pl.multiple_of(d * td, td)
    # DMA exactly the (l_output, td) window that is emitted -- no over-read.
    pltpu.sync_copy(x_hbm.at[b, pl.ds(row_start, lo), pl.ds(col, td)], buf_ref)
    out_ref[...] = buf_ref[...]


def _first_last(x, *, mode, l_output, td):
    B, L, D = x.shape
    nd = D // td
    row_start = 0 if mode == "first" else L - l_output
    return pl.pallas_call(
        functools.partial(_slice_kernel, row_start=row_start),
        out_shape=jax.ShapeDtypeStruct((B, l_output, D), x.dtype),
        grid_spec=pltpu.PrefetchScalarGridSpec(
            num_scalar_prefetch=0,
            grid=(B, nd),
            in_specs=[pl.BlockSpec(memory_space=pl.ANY)],   # raw HBM ref
            out_specs=pl.BlockSpec((None, l_output, td),
                                   lambda b, d: (b, 0, d)),
            scratch_shapes=[pltpu.VMEM((l_output, td), x.dtype)],
        ),
        compiler_params=pltpu.CompilerParams(
            dimension_semantics=("parallel", "parallel")),
    )(x)


# --------------------------------- wrapper ----------------------------------
def sequence_decoder(x, *, mode="pool", l_output=None, squeeze=False,
                     block_l=256, block_d=512):
    """Pallas implementation of SequenceDecoder.forward.

    x: (B, L, D) -> (B, l_output, D)   (or (B, D) if squeeze).
    """
    B, L, D = x.shape
    if l_output is None:
        l_output = L
    assert 0 < l_output <= L
    if squeeze:
        assert l_output == 1

    # Feature (lane) tile: a 128-multiple when it divides D, else the full D.
    td = block_d if (block_d % 128 == 0 and D % block_d == 0) else D

    if mode in ("first", "last"):
        out = _first_last(x, mode=mode, l_output=l_output, td=td)
    elif mode in ("pool", "sum"):
        # Sequence chunk for the scan path (sublane-aligned, divides L).
        lc = block_l if (block_l % 8 == 0 and L % block_l == 0) else L
        if l_output > 2 * lc:
            # Most rows kept: O(L*Lc*D) chunked prefix scan, then slice.
            out = _pool_sum_scan(x, mode=mode, lc=lc, td=td)[:, L - l_output:, :]
        else:
            # Few rows kept: compute only those rows, O(l_output*L*D).
            lk = block_l if (block_l % 128 == 0 and L % block_l == 0) else L
            out = _pool_sum_restricted(x, mode=mode, l_output=l_output,
                                       lk=lk, td=td)
    else:
        # TODO(synk): 'ragged' mode and use_lengths=True require per-batch
        # data-dependent output lengths and have no clean Pallas equivalent.
        raise NotImplementedError(mode)

    if squeeze:
        out = out[:, 0, :]
    return out


# -------------------------------- reference ---------------------------------
def _reference(x, *, mode, l_output, squeeze=False):
    """Pure-JAX reference mirroring the PyTorch forward."""
    B, L, D = x.shape
    if mode == "last":
        r = x[..., L - l_output:, :]
    elif mode == "first":
        r = x[..., :l_output, :]
    elif mode == "pool":
        counts = jnp.arange(1, L + 1, dtype=x.dtype)[:, None]
        r = (jnp.cumsum(x, axis=-2) / counts)[..., L - l_output:, :]
    elif mode == "sum":
        r = jnp.cumsum(x, axis=-2)[..., L - l_output:, :]
    else:
        raise NotImplementedError(mode)
    if squeeze:
        r = r[..., 0, :]
    return r


if __name__ == "__main__":
    root = jax.random.PRNGKey(0)
    k1, k2 = jax.random.split(root)

    def check(out, ref):
        np.testing.assert_allclose(np.asarray(out), np.asarray(ref),
                                   rtol=1e-5, atol=1e-4)

    # Small shapes: exercise the row-restricted matmul path and the slice path.
    B, L, D = 2, 16, 32
    x = jax.random.normal(k1, (B, L, D), dtype=jnp.float32)

    out = jax.block_until_ready(sequence_decoder(x, mode="pool", l_output=4))
    check(out, _reference(x, mode="pool", l_output=4))

    out = jax.block_until_ready(sequence_decoder(x, mode="sum", l_output=8))
    check(out, _reference(x, mode="sum", l_output=8))

    # config l_output=0 -> l_output=1, squeeze=True
    out = jax.block_until_ready(
        sequence_decoder(x, mode="last", l_output=1, squeeze=True))
    check(out, _reference(x, mode="last", l_output=1, squeeze=True))

    out = jax.block_until_ready(sequence_decoder(x, mode="first", l_output=None))
    check(out, _reference(x, mode="first", l_output=L))

    # Larger kept range with a small chunk -> exercises the chunked-scan path.
    B2, L2, D2 = 2, 64, 32
    x2 = jax.random.normal(k2, (B2, L2, D2), dtype=jnp.float32)

    out = jax.block_until_ready(
        sequence_decoder(x2, mode="pool", l_output=None, block_l=8))
    check(out, _reference(x2, mode="pool", l_output=L2))

    out = jax.block_until_ready(
        sequence_decoder(x2, mode="sum", l_output=40, block_l=8))
    check(out, _reference(x2, mode="sum", l_output=40))

    print("KERNEL_OK")
</pallas_src>

<mosaic_0001>
module attributes {stable_mosaic.version = 11 : i64} {
  func.func @_restricted_kernel(%arg0: i32, %arg1: i32, %arg2: i32, %arg3: memref<1x16x32xf32, #tpu.memory_space<vmem>>, %arg4: memref<4x16xf32, #tpu.memory_space<vmem>>, %arg5: memref<4x1xf32, #tpu.memory_space<vmem>>, %arg6: memref<1x4x32xf32, #tpu.memory_space<vmem>>, %arg7: memref<4x32xf32, #tpu.memory_space<vmem>>) attributes {dimension_semantics = [#tpu.dimension_semantics<parallel>, #tpu.dimension_semantics<parallel>, #tpu.dimension_semantics<arbitrary>], iteration_bounds = array<i64: 2, 1, 1>, scalar_prefetch = 0 : i64, scratch_operands = 1 : i64, tpu.core_type = #tpu.core_type<tc>, window_params = [{transform_indices = @transform_0, window_bounds = array<i64: 1, 16, 32>}, {transform_indices = @transform_1, window_bounds = array<i64: 4, 16>}, {pipeline_mode = #tpu.pipeline_mode<synchronous>, transform_indices = @transform_2, window_bounds = array<i64: 4, 1>}, {transform_indices = @transform_3, window_bounds = array<i64: 1, 4, 32>}]} {
    %c0_i32 = arith.constant 0 : i32
    %0 = arith.cmpi eq, %arg2, %c0_i32 : i32
    %1 = arith.extui %0 : i1 to i32
    %c0_i32_0 = arith.constant 0 : i32
    %2 = arith.cmpi ne, %1, %c0_i32_0 : i32
    scf.if %2 {
      %cst_11 = arith.constant 0.000000e+00 : f32
      %13 = vector.broadcast %cst_11 : f32 to vector<4x32xf32>
      %c0_12 = arith.constant 0 : index
      %c0_13 = arith.constant 0 : index
      %14 = vector.load %arg7[%c0_12, %c0_13] : memref<4x32xf32, #tpu.memory_space<vmem>>, vector<4x32xf32>
      tpu.vector_store %arg7[%c0_12, %c0_13], %13 {strides = array<i32>} : memref<4x32xf32, #tpu.memory_space<vmem>>, vector<4x32xf32>,
    } else {
    }
    %c0 = arith.constant 0 : index
    %c0_1 = arith.constant 0 : index
    %3 = vector.load %arg7[%c0, %c0_1] : memref<4x32xf32, #tpu.memory_space<vmem>>, vector<4x32xf32>
    %c0_2 = arith.constant 0 : index
    %c0_3 = arith.constant 0 : index
    %4 = vector.load %arg4[%c0_2, %c0_3] : memref<4x16xf32, #tpu.memory_space<vmem>>, vector<4x16xf32>
    %c0_4 = arith.constant 0 : index
    %c0_5 = arith.constant 0 : index
    %c0_6 = arith.constant 0 : index
    %5 = vector.load %arg3[%c0_4, %c0_5, %c0_6] : memref<1x16x32xf32, #tpu.memory_space<vmem>>, vector<1x16x32xf32>
    %6 = vector.shape_cast %5 : vector<1x16x32xf32> to vector<16x32xf32>
    %cst = arith.constant dense<0.000000e+00> : vector<4x32xf32>
    %7 = tpu.matmul %4, %6, %cst {dimension_numbers = #tpu.dot_dimension_numbers<[1], [0], [0], [1], [0, 0, 1, 1], [], []>} : vector<4x16xf32>, vector<16x32xf32>, vector<4x32xf32> -> vector<4x32xf32>
    %8 = arith.addf %3, %7 : vector<4x32xf32>
    %c0_7 = arith.constant 0 : index
    %c0_8 = arith.constant 0 : index
    %9 = vector.load %arg7[%c0_7, %c0_8] : memref<4x32xf32, #tpu.memory_space<vmem>>, vector<4x32xf32>
    tpu.vector_store %arg7[%c0_7, %c0_8], %8 {strides = array<i32>} : memref<4x32xf32, #tpu.memory_space<vmem>>, vector<4x32xf32>,
    %c0_i32_9 = arith.constant 0 : i32
    %10 = arith.cmpi eq, %arg2, %c0_i32_9 : i32
    %11 = arith.extui %10 : i1 to i32
    %c0_i32_10 = arith.constant 0 : i32
    %12 = arith.cmpi ne, %11, %c0_i32_10 : i32
    scf.if %12 {
      %c0_11 = arith.constant 0 : index
      %c0_12 = arith.constant 0 : index
      %13 = vector.load %arg7[%c0_11, %c0_12] : memref<4x32xf32, #tpu.memory_space<vmem>>, vector<4x32xf32>
      %c0_13 = arith.constant 0 : index
      %c0_14 = arith.constant 0 : index
      %14 = vector.load %arg5[%c0_13, %c0_14] : memref<4x1xf32, #tpu.memory_space<vmem>>, vector<4x1xf32>
      %15 = vector.broadcast %14 : vector<4x1xf32> to vector<4x32xf32>
      %16 = arith.mulf %13, %15 : vector<4x32xf32>
      %c0_15 = arith.constant 0 : index
      %c0_16 = arith.constant 0 : index
      %c0_17 = arith.constant 0 : index
      %17 = vector.load %arg6[%c0_15, %c0_16, %c0_17] : memref<1x4x32xf32, #tpu.memory_space<vmem>>, vector<1x4x32xf32>
      %18 = vector.shape_cast %17 : vector<1x4x32xf32> to vector<4x32xf32>
      %19 = vector.shape_cast %16 : vector<4x32xf32> to vector<1x4x32xf32>
      tpu.vector_store %arg6[%c0_15, %c0_16, %c0_17], %19 {strides = array<i32>} : memref<1x4x32xf32, #tpu.memory_space<vmem>>, vector<1x4x32xf32>,
    } else {
    }
    return
  }
  func.func @transform_0(%arg0: i32, %arg1: i32, %arg2: i32) -> (i32, i32, i32) {
    %c0_i32 = arith.constant 0 : i32
    return %arg0, %arg2, %arg1 : i32, i32, i32
  }
  func.func @transform_1(%arg0: i32, %arg1: i32, %arg2: i32) -> (i32, i32) {
    %c0_i32 = arith.constant 0 : i32
    %c0_i32_0 = arith.constant 0 : i32
    return %c0_i32, %arg2 : i32, i32
  }
  func.func @transform_2(%arg0: i32, %arg1: i32, %arg2: i32) -> (i32, i32) {
    %c0_i32 = arith.constant 0 : i32
    %c0_i32_0 = arith.constant 0 : i32
    %c0_i32_1 = arith.constant 0 : i32
    return %c0_i32, %c0_i32_0 : i32, i32
  }
  func.func @transform_3(%arg0: i32, %arg1: i32, %arg2: i32) -> (i32, i32, i32) {
    %c0_i32 = arith.constant 0 : i32
    %c0_i32_0 = arith.constant 0 : i32
    return %arg0, %c0_i32, %arg1 : i32, i32, i32
  }
}

</mosaic_0001>

<bundles_post_ra>
// kernel: tpu_custom_call.1
= control target key start
LH: loop header
LB: loop body
LE: loop exit
PB: predicated region body
PF: predicated region fallthrough
CT: control target
= control target key end

     0   :  { %8 = vsyncpa [#allocation4], 0  ;;  %s756_s0 = inlined_call_operand.hbm [shape: f32[2,16,32], index: 0, kind: input, shape index: {}]   ;;  %s757_s1 = inlined_call_operand.vmem [shape: f32[4,16], index: 1, kind: input, shape index: {}]   ;;  %s758_s2 = inlined_call_operand.vmem [shape: f32[4,1], index: 2, kind: input, shape index: {}]   ;;  %s759_s3 = inlined_call_operand.hbm [shape: f32[2,4,32], index: 3, kind: output, shape index: {}]  }
   0x1   :  { %10 = vsyncpa [#allocation4 + $0x1], 0 }
   0x2   :  { %11 = vsyncpa [#allocation5], 0 }
   0x3   :  { %13 = vsyncpa [#allocation5 + $0x1], 0  ;;  %s626_s12 = smov 0   ;;  %s628_s13 = smov 0  }
   0x4   :  { %s630_s14 = smov 0   ;;  %s632_s15 = smov 0  }
   0x5   :  { %s634_s16 = smov 0   ;;  %s636_s17 = smov 0  }
   0x6 LB: > { %s404_s18 = sadd.s32 4294967295, %s600_s17   ;;  %s405_s19 = sadd.s32 4294967294, %s600_s17   ;;  %s600_s17 = sphi %s636_s17, %s19_s17   ;;  %s596_s16 = sphi %s634_s16, %s768_s16   ;;  %s592_s15 = sphi %s632_s15, %s767_s15   ;;  %s588_s14 = sphi %s630_s14, %s766_s14   ;;  %s584_s13 = sphi %s628_s13, %s765_s13   ;;  %s580_s12 = sphi %s626_s12, %s764_s12  }
   0x7   : > { %s38_s20 = sadd.s32 1, %s596_s16  ;;  %s49_s21 = sadd.s32 1, %s588_s14 }
   0x8   : > { %p40_p0 = scmp.ge.s32.totalorder %s38_s20, 2  ;;  %p56_p1 = scmp.ne.s32.totalorder %s588_s14, %s584_s13 }
   0x9   : > { %p57_p2 = scmp.eq.s32.totalorder %s600_s17, 0  ;;  %p62_p3 = scmp.ne.s32.totalorder %s584_s13, %s580_s12 }
   0xa   : > { %s770_s20 = smov (%p40_p0, %s38_s20), 0  ;;  %p63_p5 = scmp.eq.s32.totalorder %s404_s18, 0 }
   0xb   : > { %p667_p4 = por %p57_p2, %p56_p1  ;;  %s42_s23 = ssub.s32 %s596_s16, %s770_s20 }
   0xc   : > { %p135_p6 = scmp.eq.s32.totalorder %s404_s18, 1  ;;  %p47_p7 = scmp.eq.s32.totalorder %s42_s23, 0 }
   0xd   : > { %p673_p8 = por %p63_p5, %p62_p3  ;;  %p141_p10 = scmp.eq.s32.totalorder %s405_s19, 1 }
   0xe   : > { %p677_p9 = por %p135_p6, %p56_p1  ;;  %p408_p12 = scmp.ge.s32.totalorder %s600_s17, 2 }
   0xf   : > { %s682_s26 = scalar_select %p47_p7, %s588_s14, %s49_s21  }
  0x10   : > { %p684_p11 = por %p141_p10, %p62_p3  ;;  %p433_p13 = scmp.lt.s32.totalorder %s600_s17, 2 }
  0x11   : > { %s171_s28 = sand.u32 1, %s588_s14   ;;  %s420_s30 = sshll.u32 %s596_s16, 4 }
  0x12   : > { %s409_s29 = sshll.u32 %s171_s28, 4  ;;  %s183_s6 = scalar_lea.hbm %s756_s0, %s420_s30 }
  0x13   : > { %s175_s7 = scalar_lea.vmem [#allocation3], %s409_s29  ;;  %s184_s9 = sshll.u32 %s183_s6, 4  ;;  %s185_s9 = int_to_ptr.hbm [resolvable:$true] %s184_s9 }
  0x14   : > { %s186_s8 = sshll.u32 %s175_s7, 4  ;;  %p426_p0 = pnand %p433_p13, %p667_p4  ;;  %s187_s8 = int_to_ptr.vmem [resolvable:$true] %s186_s8 }
  0x15   : > { %p412_p1 = scmp.ge.s32.totalorder %s600_s17, 1  ;;  %s172_s10 = scalar_lea.sflag [#allocation4], %s171_s28 }
  0x16   : > { %s602_s11 = smov 128   ;;  %s603_s18 = smov 8  }
  0x17   : > { %428 = dma.hbm_to_vmem [thread:$0]  (!%p426_p0), %s185_s9, 256, %s187_s8, %s172_s10, %s602_s11, %s602_s11, %s603_s18  }
  0x18   : > { %p194_p2 = scmp.lt.s32.totalorder %s600_s17, 3 }
  0x1a   : > { %p195_p3 = pnand %p412_p1, %p194_p2 }
  0x1b   : > { %s700_s19 = sand.u32 (!%p195_p3), 1, %s584_s13  }
  0x1c   : > { %198 = sbr.rel (%p195_p3) target bundleno = 179 (0xb3), region = 32  ;;  %s413_s21 = sshll.u32 (!%p195_p3), %s700_s19, 4 }
  0x1d   : > { %s201_s23 = scalar_lea.sflag (!%p195_p3), [#allocation4], %s700_s19  ;;  %s204_s29 = scalar_lea.vmem (!%p195_p3), [#allocation3], %s413_s21 }
  0x21   : > { %571 = dma.done.wait (%p673_p8), %s201_s23, 256  }
  0x22   : > { %573 = vsyncadd (%p673_p8), %s201_s23, 4294967040  ;;  %vm241_vm0 = vcmask 257024   ;;  %v604_v0 = vmov 0   ;;  %v605_v1 = vmov 0.0   ;;  %v246_v2 = vld [vmem:[%s204_s29 + $0x8] sm:$0xff]  ;;  %v245_v3 = vld [vmem:[%s204_s29] sm:$0xff] }
  0x23   : > { %487 = vset.pattern.permute.xlu0 %v604_v0  ;;  %242 = vst.msk [vmem:[#allocation2] sm:$0xf] %vm241_vm0, %v605_v1  ;;  %265 = vmatpush.msra.mxu0 %v246_v2  ;;  %v244_v4 = vld [vmem:[%s757_s1] sm:$0xf]  ;;  %vm247_vm1 = vcmask 130048   ;;  %s414_s24 = sshll.u32 %s700_s19, 2 }
  0x24   : > { %v278_v5 = vld [vmem:[%s758_s2] sm:$0xf]  ;;  %s417_s5 = sshll.u32 %s592_s15, 2  ;;  %s231_s9 = scalar_lea.vmem [#allocation6], %s414_s24 }
  0x25   : > { %281 = vperm.xlu0 %487, %v278_v5   ;;  %266 = vmatpush.msra.mxu0 %v245_v3  ;;  %s298_s8 = scalar_lea.hbm %s759_s3, %s417_s5  ;;  %s300_s10 = sshll.u32 %s231_s9, 4  ;;  %s301_s10 = int_to_ptr.vmem [resolvable:$true] %s300_s10 }
  0x26   : > { %415 = vmatmul.msk.f32.vlgmr.msra.gmra.mxu0 %vm247_vm1, %v244_v4  ;;  %s302_s11 = sshll.u32 %s298_s8, 4  ;;  %s287_s18 = scalar_lea.sflag [#allocation5], %s700_s19  ;;  %s303_s11 = int_to_ptr.hbm [resolvable:$true] %s302_s11 }
  0x27   : > { %s532_s21 = sshra.s32 %s303_s11, 4  ;;  %s538_s22 = scalar_lea.hbm %s759_s3, 8  ;;  %s533_s21 = int_to_ptr.hbm [resolvable:$true] %s532_s21 }
  0x28   : > { %s534_s15 = scalar_lea.hbm %s533_s21, 4  ;;  %p539_p7 = scmp.lt.s32.totalorder %s533_s21, %s759_s3 }
  0x29   : > { %p535_p4 = scmp.ne.s32.totalorder %s533_s21, %s534_s15  ;;  %p540_p8 = scmp.lt.s32.totalorder %s538_s22, %s534_s15 }
  0x2a   : > { %v243_v6 = vld [vmem:[#allocation2] sm:$0xf] }
  0x2b   : > { %p536_p5 = pnand %p535_p4, %p677_p9  ;;  %p541_p10 = por %p540_p8, %p539_p7 }
  0x2d   : > { %p537_p6 = pneg %p536_p5 }
  0x2f   : > { %p542_p13 = pnand %p541_p10, %p537_p6 }
  0x97   : > { %v282_v9 = vpop.permute.xlu0 %281 }
  0xa3   : > { %v268_v7 = vpop.f32.mrf.mxu0 }
  0xa4   : > { %v271_v8 = vadd.f32 %v268_v7, %v243_v6 }
  0xa6   : > { %273 = vst.msk [vmem:[#allocation2] sm:$0xf] %vm241_vm0, %v271_v8 }
  0xad   : > { %v277_v10 = vld [vmem:[#allocation2] sm:$0xf] }
  0xae   : > { %v284_v11 = vmul.f32 %v282_v9, %v277_v10 }
  0xb0   : > { %285 = vst.msk [vmem:[%s231_s9] sm:$0xf] %vm241_vm0, %v284_v11 }
  0xb1   : > { %545 = shalt.err (!%p542_p13)
}
  0xb2   : > { %423 = dma.vmem_to_hbm [thread:$0]  (%p677_p9), %s301_s10, 64, %s303_s11, %s287_s18  }
  0xb3 PF: > { %s314_s19 = sand.u32 1, %s580_s12   ;;  %p430_p0 = pnand %p408_p12, %p684_p11 }
  0xb4   : > { %s315_s4 = scalar_lea.sflag [#allocation5], %s314_s19 }
  0xb5   : > { %p431_p1 = pneg %p430_p0 }
  0xb7   : > { %575 = dma.done.wait (%p431_p1), %s315_s4, 64  }
  0xb8   : > { %577 = vsyncadd (%p431_p1), %s315_s4, 4294967232  ;;  %s19_s17 = sadd.s32 1, %s600_s17   ;;  %s764_s12 = smov %s584_s13 }
  0xb9   : > { %p16_p2 = scmp.ge.s32.totalorder %s19_s17, 4   ;;  %s765_s13 = smov %s588_s14 }
  0xba   : > { %s766_s14 = smov %s682_s26  ;;  %s767_s15 = smov %s596_s16 }
  0xbb   : > { %s768_s16 = smov %s770_s20  ;;  %18 = sbr.rel (!%p16_p2) target bundleno = 6 (0x6), region = 88 }
  0xc0   :  { %321 = vsyncpa [#allocation4], 1 }
  0xc1   :  { %323 = vsyncpa [#allocation4 + $0x1], 1 }
  0xc2   :  { %324 = vsyncpa [#allocation5], 1 }
  0xc3   :  { %326 = vsyncpa [#allocation5 + $0x1], 1 }

</bundles_post_ra>
